<compile_context>
chip_gen: v5e
topology: v5e:2x2
jax: 0.10.0
libtpu: 0.0.40
codegen_flags: <defaults>
</compile_context>

<pallas_src>
import functools

import jax
import jax.numpy as jnp
from jax import lax
from jax.experimental import pallas as pl
from jax.experimental.pallas import tpu as pltpu


_X_TILE_BYTES = 8 * 1024 * 1024   # per-buffer streamed-x tile target
_TM_CAP = 8192                    # max rows per grid step
_VMEM_LIMIT = 48 * 1024 * 1024    # explicit scoped-VMEM budget: > v5e's 16 MiB
                                  # default, < v7x's 64 MiB physical


def _round_up(x, m):
    return ((x + m - 1) // m) * m


# ----------------------------------------------------------------------------
# Kernels
# ----------------------------------------------------------------------------
def _linear_kernel(x_ref, w_ref, b_ref, o_ref, *, dout):
    """o = (x @ W)[:, :dout] + b.   x:(tm, Din)  W:(Din, Dout_p)  b:(1, dout)."""
    x = x_ref[...].astype(w_ref.dtype)        # in-kernel cast (free under mem-bound)
    acc = jnp.dot(x, w_ref[...], preferred_element_type=jnp.float32)
    o_ref[...] = (acc[:, :dout] + b_ref[...]).astype(o_ref.dtype)


def _consensus_linear_kernel(x_ref, w_ref, b_ref, o_ref, acc_ref, *,
                             mode, dout, t_total, need_mask):
    """Fused consensus-over-seq (grid reduction over T) + fc.

    x:(tb, tt, Din)  W:(Din, Dout_p)  b:(1, dout)  o:(tb, dout)
    acc:(tb, Din) f32 scratch, resident across the T grid axis.
    """
    t = pl.program_id(1)
    last = pl.num_programs(1) - 1

    @pl.when(t == 0)
    def _():
        if mode == "avg":
            acc_ref[...] = jnp.zeros(acc_ref.shape, acc_ref.dtype)
        else:  # "max"
            acc_ref[...] = jnp.full(acc_ref.shape, -jnp.inf, acc_ref.dtype)

    def _accumulate(x):
        if mode == "avg":
            acc_ref[...] += jnp.sum(x, axis=1, dtype=jnp.float32)
        else:
            acc_ref[...] = jnp.maximum(acc_ref[...],
                                       jnp.max(x, axis=1).astype(jnp.float32))

    if need_mask:
        tt = x_ref.shape[1]

        @pl.when(t < last)
        def _():                       # full blocks: unmasked accumulate
            _accumulate(x_ref[...])

        @pl.when(t == last)
        def _():                       # only the ragged last block pays the mask
            idx = t * tt + lax.broadcasted_iota(jnp.int32, (1, tt, 1), 1)
            valid = idx < t_total
            fill = (jnp.zeros((), x_ref.dtype) if mode == "avg"
                    else jnp.array(-jnp.inf, x_ref.dtype))
            _accumulate(jnp.where(valid, x_ref[...], fill))
    else:
        _accumulate(x_ref[...])

    @pl.when(t == last)
    def _():
        r = acc_ref[...]
        if mode == "avg":
            r = r * jnp.float32(1.0 / t_total)
        acc = jnp.dot(r.astype(w_ref.dtype), w_ref[...],
                      preferred_element_type=jnp.float32)
        o_ref[...] = (acc[:, :dout] + b_ref[...]).astype(o_ref.dtype)


# ----------------------------------------------------------------------------
# pallas_call wrappers
# ----------------------------------------------------------------------------
def _call_linear(x2d, w_p, b, *, tm=None):
    m, din = x2d.shape
    dout_p = w_p.shape[1]
    dout = b.shape[1]
    itemsize = x2d.dtype.itemsize

    if tm is None:
        tm = ((_X_TILE_BYTES // max(1, din * itemsize)) // 8) * 8
        tm = max(8, min(tm, _TM_CAP))
        # v7x megacore: keep >= 2 blocks on the parallel M axis when possible.
        tm = min(tm, max(8, _round_up(pl.cdiv(m, 2), 8)))
    if m <= tm:
        tm = m  # full extent is always a legal block dim

    grid = (pl.cdiv(m, tm),)
    flops = 2 * m * din * dout_p
    bytes_accessed = (m * din * itemsize + m * dout * itemsize
                      + din * dout_p * w_p.dtype.itemsize + dout * 4)

    return pl.pallas_call(
        functools.partial(_linear_kernel, dout=dout),
        out_shape=jax.ShapeDtypeStruct((m, dout), x2d.dtype),
        grid=grid,
        in_specs=[
            pl.BlockSpec((tm, din), lambda i: (i, 0)),        # streamed x
            pl.BlockSpec((din, dout_p), lambda i: (0, 0)),    # resident weight
            pl.BlockSpec((1, dout), lambda i: (0, 0)),        # resident bias (f32)
        ],
        out_specs=pl.BlockSpec((tm, dout), lambda i: (i, 0)),  # unpadded output
        compiler_params=pltpu.CompilerParams(
            dimension_semantics=("parallel",),
            vmem_limit_bytes=_VMEM_LIMIT),
        cost_estimate=pl.CostEstimate(flops=flops, transcendentals=0,
                                      bytes_accessed=bytes_accessed),
    )(x2d, w_p, b)


def _call_consensus_linear(x3d, w_p, b, mode, *, tb=None, tt=None):
    bsz, t_total, din = x3d.shape
    dout_p = w_p.shape[1]
    dout = b.shape[1]
    itemsize = x3d.dtype.itemsize

    if tb is None:
        if bsz <= 8:
            tb = bsz
        else:
            # v7x megacore: >= 2 blocks on the parallel B axis, tile up to 128.
            tb = min(128, _round_up(pl.cdiv(bsz, 2), 8))
    if bsz <= tb:
        tb = bsz
    if tt is None:
        tt = ((_X_TILE_BYTES // max(1, tb * din * itemsize)) // 8) * 8
        tt = max(8, min(tt, 2048))
    if t_total <= tt:
        tt = t_total
    need_mask = (t_total % tt) != 0

    grid = (pl.cdiv(bsz, tb), pl.cdiv(t_total, tt))
    kernel = functools.partial(_consensus_linear_kernel, mode=mode, dout=dout,
                               t_total=t_total, need_mask=need_mask)
    flops = bsz * t_total * din + 2 * bsz * din * dout_p
    bytes_accessed = (bsz * t_total * din * itemsize + bsz * dout * itemsize
                      + din * dout_p * w_p.dtype.itemsize + dout * 4)

    return pl.pallas_call(
        kernel,
        out_shape=jax.ShapeDtypeStruct((bsz, dout), x3d.dtype),
        grid=grid,
        in_specs=[
            pl.BlockSpec((tb, tt, din), lambda i, j: (i, j, 0)),  # streamed x
            pl.BlockSpec((din, dout_p), lambda i, j: (0, 0)),     # resident W
            pl.BlockSpec((1, dout), lambda i, j: (0, 0)),         # resident b
        ],
        out_specs=pl.BlockSpec((tb, dout), lambda i, j: (i, 0)),  # unpadded out
        scratch_shapes=[pltpu.VMEM((tb, din), jnp.float32)],
        compiler_params=pltpu.CompilerParams(
            dimension_semantics=("parallel", "arbitrary"),
            vmem_limit_bytes=_VMEM_LIMIT),
        cost_estimate=pl.CostEstimate(flops=flops, transcendentals=0,
                                      bytes_accessed=bytes_accessed),
    )(x3d, w_p, b)


# ----------------------------------------------------------------------------
# Module-equivalent wrapper
# ----------------------------------------------------------------------------
class SpatialExtLinearPallas:
    """JAX/Pallas equivalent of SpatialExtLinear.forward (inference)."""

    def __init__(self, input_size=128, output_size=8, consensus=None,
                 dense_data=False, reshape_output=False, key=None,
                 param_dtype=jnp.bfloat16, tm=None, tb=None, tt=None):
        assert consensus in [None, "max", "avg", "flat"]
        self.input_size = input_size
        self.output_size = output_size
        self.consensus = consensus
        self.dense_data = dense_data
        self.reshape_output = reshape_output
        self.param_dtype = param_dtype
        self.tm, self.tb, self.tt = tm, tb, tt

        if key is None:
            key = jax.random.PRNGKey(0)
        kw, kb = jax.random.split(key)
        # Deterministic init matching nn.Linear's U(-1/sqrt(in), 1/sqrt(in));
        # PyTorch stores W as (out, in); we keep the transposed (in, out) copy
        # in f32 for reference and a lane-padded compute copy in param_dtype.
        bound = 1.0 / (input_size ** 0.5)
        self.weight_t = jax.random.uniform(
            kw, (input_size, output_size), jnp.float32, -bound, bound)
        self.bias = jax.random.uniform(
            kb, (1, output_size), jnp.float32, -bound, bound)

        # Weight padded to a lane-dense Dout_p (multiple of 128, zero columns);
        # output stays unpadded (sliced in-kernel).  Bias stays f32.
        dout_p = _round_up(output_size, 128)
        self.dout_p = dout_p
        w = self.weight_t
        if dout_p != output_size:
            w = jnp.pad(w, ((0, 0), (0, dout_p - output_size)))
        self.weight_p = w.astype(param_dtype)

    def __call__(self, x):
        batch_size = x.shape[0]

        if self.dense_data:
            # TODO(synk): dense_data branch depends on lfd_params.args.dense_rate
            # and is shape-inconsistent in the reference; not implemented.
            raise NotImplementedError("dense_data path not implemented")

        if self.consensus in ("max", "avg"):
            # TODO(synk): >3-D inputs for max/avg consensus not implemented.
            assert x.ndim == 3 and x.shape[-1] == self.input_size, \
                "max/avg consensus expects (B, T, input_size)"
            out2d = _call_consensus_linear(x, self.weight_p, self.bias,
                                           self.consensus,
                                           tb=self.tb, tt=self.tt)
            out = out2d[:, None, :]
        elif self.consensus == "flat":
            # torch.flatten(x, 1, 2), then fc on the last dim.
            x_flat = (x.reshape((batch_size, -1) + x.shape[3:])
                      if x.ndim > 3 else x.reshape(batch_size, -1))
            assert x_flat.shape[-1] == self.input_size, \
                "flat consensus: flattened feature dim must equal input_size"
            lead = x_flat.shape[:-1]
            out2d = _call_linear(x_flat.reshape(-1, self.input_size),
                                 self.weight_p, self.bias, tm=self.tm)
            out = out2d.reshape(lead + (self.output_size,))
        else:  # consensus is None: fc applied to last dim of x as-is
            assert x.shape[-1] == self.input_size
            lead = x.shape[:-1]
            out2d = _call_linear(x.reshape(-1, self.input_size),
                                 self.weight_p, self.bias, tm=self.tm)
            out = out2d.reshape(lead + (self.output_size,))

        if self.reshape_output:
            out = jnp.squeeze(out, axis=1)
        return out


# ----------------------------------------------------------------------------
# Reference (pure jnp) for a sanity check
# ----------------------------------------------------------------------------
def _ref_forward(mod, x):
    if mod.consensus == "max":
        r = jnp.max(x, axis=1, keepdims=True)
    elif mod.consensus == "avg":
        r = jnp.mean(x, axis=1)[:, None, :]
    elif mod.consensus == "flat":
        r = (x.reshape(x.shape[0], -1, x.shape[-1]) if x.ndim > 3
             else x.reshape(x.shape[0], -1))
    else:
        r = x
    out = jnp.dot(r, mod.weight_t, precision=lax.Precision.HIGHEST) + mod.bias[0]
    if mod.reshape_output:
        out = jnp.squeeze(out, axis=1)
    return out


if __name__ == "__main__":
    key = jax.random.PRNGKey(0)
    kx, kp = jax.random.split(key)

    B, T, D_IN, D_OUT = 2, 12, 32, 8
    x = jax.random.normal(kx, (B, T, D_IN), jnp.float32)

    ok = True

    def check(mod, xin, atol, rtol):
        out = jax.block_until_ready(mod(xin))
        ref = _ref_forward(mod, xin)
        return (out.shape == ref.shape) and bool(
            jnp.allclose(out.astype(jnp.float32), ref, atol=atol, rtol=rtol))

    # f32 params: tight tolerance, exact masking/structure check.
    for consensus, ro in [(None, False), ("avg", True), ("max", False)]:
        mod = SpatialExtLinearPallas(input_size=D_IN, output_size=D_OUT,
                                     consensus=consensus, reshape_output=ro,
                                     key=kp, param_dtype=jnp.float32)
        ok &= check(mod, x, 1e-3, 1e-3)

    # bf16 params (default fast path): looser tolerance.
    for consensus, ro in [(None, False), ("avg", True), ("max", False)]:
        mod = SpatialExtLinearPallas(input_size=D_IN, output_size=D_OUT,
                                     consensus=consensus, reshape_output=ro,
                                     key=kp)
        ok &= check(mod, x, 5e-2, 5e-2)

    # Explicit small tiles: ragged M blocks (24 % 16 != 0) and ragged T blocks
    # (12 % 8 != 0), f32 params so masking bugs are not hidden by bf16 noise.
    ok &= check(SpatialExtLinearPallas(input_size=D_IN, output_size=D_OUT,
                                       consensus=None, key=kp,
                                       param_dtype=jnp.float32, tm=16),
                x, 1e-3, 1e-3)
    ok &= check(SpatialExtLinearPallas(input_size=D_IN, output_size=D_OUT,
                                       consensus="avg", reshape_output=True,
                                       key=kp, param_dtype=jnp.float32, tt=8),
                x, 1e-3, 1e-3)
    ok &= check(SpatialExtLinearPallas(input_size=D_IN, output_size=D_OUT,
                                       consensus="max", key=kp,
                                       param_dtype=jnp.float32, tt=8),
                x, 1e-3, 1e-3)

    # 'flat' consensus: fc input size is T * D_IN after flatten(1, 2) of 3-D x.
    ok &= check(SpatialExtLinearPallas(input_size=T * D_IN, output_size=D_OUT,
                                       consensus="flat", key=kp,
                                       param_dtype=jnp.float32), x, 1e-3, 1e-3)

    if ok:
        print("KERNEL_OK")
</pallas_src>

<mosaic_0001>
module attributes {stable_mosaic.version = 11 : i64} {
  func.func @_linear_kernel(%arg0: i32, %arg1: memref<16x32xf32, #tpu.memory_space<vmem>>, %arg2: memref<32x128xf32, #tpu.memory_space<vmem>>, %arg3: memref<1x8xf32, #tpu.memory_space<vmem>>, %arg4: memref<16x8xf32, #tpu.memory_space<vmem>>) attributes {dimension_semantics = [#tpu.dimension_semantics<parallel>], iteration_bounds = array<i64: 2>, scalar_prefetch = 0 : i64, scratch_operands = 0 : i64, tpu.core_type = #tpu.core_type<tc>, window_params = [{transform_indices = @transform_0, window_bounds = array<i64: 16, 32>}, {pipeline_mode = #tpu.pipeline_mode<synchronous>, transform_indices = @transform_1, window_bounds = array<i64: 32, 128>}, {pipeline_mode = #tpu.pipeline_mode<synchronous>, transform_indices = @transform_2, window_bounds = array<i64: 1, 8>}, {transform_indices = @transform_3, window_bounds = array<i64: 16, 8>}]} {
    %c0 = arith.constant 0 : index
    %c0_0 = arith.constant 0 : index
    %0 = vector.load %arg1[%c0, %c0_0] : memref<16x32xf32, #tpu.memory_space<vmem>>, vector<16x32xf32>
    %c0_1 = arith.constant 0 : index
    %c0_2 = arith.constant 0 : index
    %1 = vector.load %arg2[%c0_1, %c0_2] : memref<32x128xf32, #tpu.memory_space<vmem>>, vector<32x128xf32>
    %cst = arith.constant dense<0.000000e+00> : vector<16x128xf32>
    %2 = tpu.matmul %0, %1, %cst {dimension_numbers = #tpu.dot_dimension_numbers<[1], [0], [0], [1], [0, 0, 1, 1], [], []>} : vector<16x32xf32>, vector<32x128xf32>, vector<16x128xf32> -> vector<16x128xf32>
    %3 = vector.extract_strided_slice %2 {offsets = [0, 0], sizes = [16, 8], strides = [1, 1]} : vector<16x128xf32> to vector<16x8xf32>
    %c0_3 = arith.constant 0 : index
    %c0_4 = arith.constant 0 : index
    %4 = vector.load %arg3[%c0_3, %c0_4] : memref<1x8xf32, #tpu.memory_space<vmem>>, vector<1x8xf32>
    %5 = vector.broadcast %4 : vector<1x8xf32> to vector<16x8xf32>
    %6 = arith.addf %3, %5 : vector<16x8xf32>
    %c0_5 = arith.constant 0 : index
    %c0_6 = arith.constant 0 : index
    %7 = vector.load %arg4[%c0_5, %c0_6] : memref<16x8xf32, #tpu.memory_space<vmem>>, vector<16x8xf32>
    tpu.vector_store %arg4[%c0_5, %c0_6], %6 {strides = array<i32>} : memref<16x8xf32, #tpu.memory_space<vmem>>, vector<16x8xf32>,
    return
  }
  func.func @transform_0(%arg0: i32) -> (i32, i32) {
    %c0_i32 = arith.constant 0 : i32
    %c0_i32_0 = arith.constant 0 : i32
    return %arg0, %c0_i32 : i32, i32
  }
  func.func @transform_1(%arg0: i32) -> (i32, i32) {
    %c0_i32 = arith.constant 0 : i32
    %c0_i32_0 = arith.constant 0 : i32
    %c0_i32_1 = arith.constant 0 : i32
    return %c0_i32, %c0_i32_0 : i32, i32
  }
  func.func @transform_2(%arg0: i32) -> (i32, i32) {
    %c0_i32 = arith.constant 0 : i32
    %c0_i32_0 = arith.constant 0 : i32
    %c0_i32_1 = arith.constant 0 : i32
    return %c0_i32, %c0_i32_0 : i32, i32
  }
  func.func @transform_3(%arg0: i32) -> (i32, i32) {
    %c0_i32 = arith.constant 0 : i32
    %c0_i32_0 = arith.constant 0 : i32
    return %arg0, %c0_i32 : i32, i32
  }
}

</mosaic_0001>

<bundles_post_ra>
// kernel: tpu_custom_call.1
= control target key start
LH: loop header
LB: loop body
LE: loop exit
PB: predicated region body
PF: predicated region fallthrough
CT: control target
= control target key end

     0   :  { %8 = vsyncpa [#allocation3], 0  ;;  %s1034_s0 = inlined_call_operand.hbm [shape: f32[24,32], index: 0, kind: input, shape index: {}]   ;;  %s1035_s1 = inlined_call_operand.hbm [shape: f32[32,128], index: 1, kind: input, shape index: {}]   ;;  %s1036_s2 = inlined_call_operand.vmem [shape: f32[1,8], index: 2, kind: input, shape index: {}]   ;;  %s1037_s3 = inlined_call_operand.vmem [shape: f32[24,8], index: 3, kind: output, shape index: {}]  }
   0x1   :  { %10 = vsyncpa [#allocation3 + $0x1], 0 }
   0x2   :  { %11 = vsyncpa [#allocation5], 0  ;;  %s861_s12 = smov 0   ;;  %s863_s13 = smov 0  }
   0x3   :  { %s865_s14 = smov 0   ;;  %s867_s15 = smov 0  }
   0x4 LB: > { %s880_s16 = sadd.s32 4294967295, %s801_s15   ;;  %s883_s17 = sadd.s32 1, %s801_s15   ;;  %s801_s15 = sphi %s867_s15, %s1049_s15   ;;  %s797_s14 = sphi %s865_s14, %s1048_s14   ;;  %s793_s13 = sphi %s863_s13, %s1047_s13   ;;  %s789_s12 = sphi %s861_s12, %s1046_s12  }
   0x5   : > { %s21_s18 = ssub.s32 %s801_s15, %s883_s17  ;;  %s24_s19 = sadd.s32 1, %s797_s14 }
   0x6   : > { %p22_p0 = scmp.eq.s32.totalorder %s21_s18, 0  ;;  %p31_p1 = scmp.ne.s32.totalorder %s797_s14, %s793_s13 }
   0x7   : > { %p32_p2 = scmp.eq.s32.totalorder %s801_s15, 0  ;;  %p37_p3 = scmp.ne.s32.totalorder %s793_s13, %s789_s12 }
   0x8   : > { %s893_s20 = scalar_select %p22_p0, %s797_s14, %s24_s19  }
   0x9   : > { %p895_p4 = por %p32_p2, %p31_p1  ;;  %p1038_p5 = scmp.eq.s32.totalorder %s880_s16, 0 }
   0xa   : > { %p103_p6 = scmp.eq.s32.totalorder %s880_s16, 1  ;;  %p508_p7 = scmp.ge.s32.totalorder %s801_s15, 1 }
   0xb   : > { %p904_p8 = por %p1038_p5, %p37_p3  ;;  %p116_p9 = scmp.lt.s32.totalorder %s801_s15, 3 }
   0xc   : > { %p909_p10 = por %p103_p6, %p31_p1  ;;  %s127_s27 = sshll.u32 %s1035_s1, 4  ;;  %s128_s27 = int_to_ptr.hbm [resolvable:$true] %s127_s27 }
   0xd   : > { %p913_p11 = pnand %p508_p7, %p116_p9  ;;  %s835_s28 = smov [#allocation4]  }
   0xe   : > { %s129_s29 = sshll.u32 %s835_s28, 4  ;;  %s836_s30 = smov 128   ;;  %s130_s29 = int_to_ptr.vmem [resolvable:$true] %s129_s29 }
   0xf   : > { %p554_p12 = pneg %p913_p11  ;;  %s837_s4 = smov 8  }
  0x10   : > { %p510_p0 = scmp.ge.s32.totalorder %s801_s15, 2 }
  0x11   : > { %p555_p13 = pnand %p554_p12, %p1038_p5 }
  0x12   : > { %142 = sbr.rel (%p510_p0) target bundleno = 59 (0x3b), region = 24 }
  0x13   : > { %557 = dma.hbm_to_vmem [thread:$0]  (!%p555_p13), %s128_s27, 512, %s130_s29, [#allocation5], %s836_s30, %s836_s30, %s837_s4  }
  0x17   : > { %145 = sbr.rel (!%p895_p4) target bundleno = 59 (0x3b), region = 28  ;;  %s146_s5 = sand.u32 (%p895_p4), 1, %s797_s14  }
  0x18   : > { %s512_s6 = sshll.u32 (%p895_p4), %s801_s15, 1  ;;  %s511_s7 = sshll.u32 (%p895_p4), %s146_s5, 4 }
  0x19   : > { %s152_s8 = ssub.s32 (%p895_p4), 3, %s512_s6  ;;  %s932_s12 = scalar_lea.sflag (%p895_p4), [#allocation3], %s146_s5 }
  0x1a   : > { %p153_p1 = scmp.lt.s32.totalorder (%p895_p4), %s152_s8, 2  ;;  %s150_s18 = scalar_lea.vmem (%p895_p4), [#allocation2], %s511_s7 }
  0x1c   : > { %s1051_s8 = smov (!%p153_p1, %s152_s8), 2 }
  0x1d   : > { %s513_s9 = sshll.u32 %s1051_s8, 3 }
  0x1e   : > { %s156_s10 = ssub.s32 16, %s513_s9 }
  0x1f   : > { %s157_s11 = sshll.u32 %s156_s10, 4 }
  0x20   : > { %158 = vsyncadd %s932_s12, %s157_s11  ;;  %p935_p2 = scmp.ne.s32.totalorder %s513_s9, 0  ;;  %s541_s21 = sshll.u32 %s801_s15, 4 }
  0x21   : > { %s161_s27 = scalar_lea.hbm %s1034_s0, %s541_s21  ;;  %s943_s28 = sshll.u32 %s150_s18, 4  ;;  %s166_s28 = int_to_ptr.vmem [resolvable:$true] %s943_s28 }
  0x22   : > { %s163_s29 = sshll.u32 %s161_s27, 4  ;;  %s517_s30 = sshll.u32 %s1051_s8, 7  ;;  %s946_s29 = int_to_ptr.hbm [resolvable:$true] %s163_s29 }
  0x23   : > { %s692_s4 = sshra.s32 %s946_s29, 4  ;;  %s694_s5 = sshrl.u32 %s517_s30, 4  ;;  %s693_s4 = int_to_ptr.hbm [resolvable:$true] %s692_s4 }
  0x24   : > { %s699_s6 = scalar_lea.hbm %s693_s4, %s694_s5  ;;  %s703_s9 = scalar_lea.hbm %s1034_s0, 24 }
  0x25   : > { %p700_p3 = scmp.ne.s32.totalorder %s693_s4, %s699_s6  ;;  %p704_p7 = scmp.lt.s32.totalorder %s693_s4, %s1034_s0 }
  0x26   : > { %p705_p9 = scmp.lt.s32.totalorder %s703_s9, %s699_s6 }
  0x27   : > { %p701_p4 = pnand %p700_p3, %p935_p2 }
  0x28   : > { %p706_p12 = por %p705_p9, %p704_p7 }
  0x29   : > { %p702_p6 = pneg %p701_p4 }
  0x2b   : > { %p707_p13 = pnand %p706_p12, %p702_p6 }
  0x2d   : > { %710 = shalt.err (!%p707_p13)
}
  0x2e   : > { %s711_s18 = sshra.s32 %s166_s28, 4  ;;  %s838_s25 = smov [#allocation2]   ;;  %s712_s18 = int_to_ptr.vmem [resolvable:$true] %s711_s18 }
  0x2f   : > { %s718_s21 = scalar_lea.vmem %s712_s18, %s694_s5  ;;  %s722_s26 = scalar_lea.vmem %s838_s25, 32 }
  0x30   : > { %p719_p0 = scmp.ne.s32.totalorder %s712_s18, %s718_s21  ;;  %p724_p4 = scmp.lt.s32.totalorder %s722_s26, %s718_s21 }
  0x32   : > { %p720_p1 = pnand %p719_p0, %p935_p2 }
  0x34   : > { %p721_p3 = pneg %p720_p1 }
  0x36   : > { %p726_p5 = pnand %p724_p4, %p721_p3 }
  0x38   : > { %729 = shalt.err (!%p726_p5)
}
  0x39   : > { %s839_s27 = smov 128   ;;  %s840_s4 = smov 8  }
  0x3a   : > { %171 = dma.hbm_to_vmem [thread:$0]  (%p935_p2), %s946_s29, %s517_s30, %s166_s28, %s932_s12, %s839_s27, %s839_s27, %s840_s4  }
  0x3b PF: > { %177 = sbr.rel (%p913_p11) target bundleno = 245 (0xf5), region = 32  ;;  %s179_s5 = sand.u32 (!%p913_p11), 1, %s793_s13  }
  0x3c   : > { %s519_s6 = sshll.u32 (!%p913_p11), %s179_s5, 4  ;;  %s180_s15 = scalar_lea.sflag (!%p913_p11), [#allocation3], %s179_s5 }
  0x3d   : > { %s183_s7 = scalar_lea.vmem (!%p913_p11), [#allocation2], %s519_s6 }
  0x40   : > { %780 = dma.done.wait (%p904_p8), %s180_s15, 256  }
  0x41   : > { %782 = vsyncadd (%p904_p8), %s180_s15, 4294967040  ;;  %p1044_p5 = scmp.eq.s32.totalorder %s880_s16, 0 }
  0x43   : > { %784 = dma.done.wait (%p1044_p5), [#allocation5], 512   ;;  %p1045_p2 = pmov %p1044_p5 }
  0x44   : > { %v226_v0 = vld [vmem:[#allocation4 + $0x18] sm:$0xff]  ;;  %v225_v1 = vld [vmem:[#allocation4 + $0x10] sm:$0xff]  ;;  %v224_v2 = vld [vmem:[#allocation4 + $0x8] sm:$0xff]  ;;  %vm227_vm0 = vcmask 261120   ;;  %vm263_vm1 = vcmask 64512   ;;  %s986_s8 = scalar_lea.vmem [#allocation6], %s519_s6  }
  0x45   : > { %786 = vsyncadd (%p1045_p2), [#allocation5], 4294966784  ;;  %246 = vmatpush.msra.mxu0 %v226_v0  ;;  %545 = vmatpush.msra.mxu1 %v226_v0  ;;  %v223_v3 = vld [vmem:[#allocation4] sm:$0xff]  ;;  %v222_v5 = vld [vmem:[%s183_s7 + $0x8] sm:$0xff]  ;;  %s525_s12 = sshll.u32 (%p909_p10), %s880_s16, 1  ;;  %s542_s19 = sshll.u32 (%p909_p10), %s880_s16, 4 }
  0x46   : > { %v221_v4 = vld [vmem:[%s183_s7] sm:$0xff]  ;;  %s274_s28 = ssub.s32 (%p909_p10), 3, %s525_s12  ;;  %s997_s9 = scalar_lea.vmem (%p909_p10), %s1037_s3, %s542_s19  }
  0x47   : > { %247 = vmatpush.msra.mxu0 %v225_v1  ;;  %546 = vmatpush.msra.mxu1 %v225_v1  ;;  %v661_v6 = vld [vmem:[%s1036_s2] ss:$0 sm:$0xff]  ;;  %p275_p8 = scmp.lt.s32.totalorder (%p909_p10), %s274_s28, 2 }
  0x49   : > { %248 = vmatpush.msra.mxu0 %v224_v2  ;;  %547 = vmatpush.msra.mxu1 %v224_v2 }
  0x4b   : > { %249 = vmatpush.msra.mxu0 %v223_v3  ;;  %548 = vmatpush.msra.mxu1 %v223_v3 }
  0x4c   : > { %522 = vmatmul.msk.f32.vlgmr.msra.gmra.mxu0 %vm227_vm0, %v221_v4  ;;  %523 = vmatmul.msk.f32.vlgmr.msra.gmra.mxu1 %vm227_vm0, %v222_v5 }
  0xc9   : > { %v251_v7 = vpop.f32.mrf.mxu0  ;;  %v254_v8 = vpop.f32.mrf.mxu1  ;;  %272 = sbr.rel (!%p909_p10) target bundleno = 245 (0xf5), region = 44 }
  0xca   : > { %v261_v9 = vadd.f32 %v661_v6, %v251_v7  ;;  %v262_v10 = vadd.f32 %v661_v6, %v254_v8 }
  0xcc   : > { %264 = vst.msk [vmem:[%s986_s8] sm:$0xff] %vm263_vm1, %v261_v9 }
  0xcd   : > { %265 = vst.msk [vmem:[%s986_s8 + $0x8] sm:$0xff] %vm263_vm1, %v262_v10 }
  0xce   : > { %s1053_s28 = smov (!%p275_p8, %s274_s28), 2 }
  0xcf   : > { %s526_s10 = sshll.u32 %s1053_s28, 3 }
  0xd0   : > { %p529_p11 = scmp.eq.s32.totalorder %s526_s10, 0 }
  0xd1   : > { %s1003_s23 = sshrl.u32 (!%p529_p11), %s1053_s28, 1 }
  0xd2   : > { %283 = sbr.rel (%p529_p11) target bundleno = 245 (0xf5), region = 48  ;;  %p530_p10 = scmp.le.s32.totalorder (!%p529_p11), %s1003_s23, 0 }
  0xd7   : > { %451 = sbr.rel (%p530_p10) target bundleno = 228 (0xe4), region = 130  ;;  %s803_s16 = smov (!%p530_p10), %s997_s9  }
  0xd8   : > { %s807_s11 = smov (!%p530_p10), %s986_s8   ;;  %s811_s18 = smov (!%p530_p10), 0  }
  0xd9   : > { %s815_s21 = smov (!%p530_p10), 0  }
  0xdc LB: >> { %v348_v11 = vld [vmem:[%s809_s11] sm:$0xff]  ;;  %v350_v12 = vld [vmem:[%s809_s11 + $0x8] sm:$0xff]  ;;  %s352_s25 = sadd.s32 1, %s813_s18  ;;  %s342_s21 = sadd.s32 1, %s817_s21   ;;  %s817_s21 = sphi %s815_s21, %s342_s21   ;;  %s813_s18 = sphi %s811_s18, %s812_s18   ;;  %s809_s11 = sphi %s807_s11, %s357_s11   ;;  %s805_s16 = sphi %s803_s16, %s358_s16  }
  0xdd   : >> { %349 = vst [vmem:[%s805_s16] sm:$0xff] %v348_v11  ;;  %p353_p6 = scmp.ge.s32.totalorder %s352_s25, %s1003_s23  ;;  %p341_p7 = scmp.ge.s32.totalorder %s342_s21, %s1003_s23 }
  0xde   : >> { %351 = vst [vmem:[%s805_s16 + $0x8] sm:$0xff] %v350_v12 }
  0xdf   : >> { %s1055_s25 = smov (%p353_p6, %s352_s25), 0  ;;  %344 = sbr.rel (!%p341_p7) target bundleno = 220 (0xdc), region = 136 }
  0xe0   : >> { %s531_s26 = sshll.u32 %s1055_s25, 4  ;;  %s812_s18 = smov %s1055_s25  }
  0xe1   : >> { %s357_s11 = scalar_lea.vmem %s986_s8, %s531_s26 [#allocation6]   ;;  %s358_s16 = scalar_lea.vmem %s997_s9, %s531_s26  }
  0xe4 PF: > { %s1013_s27 = sand.u32 1, %s1053_s28   ;;  %s543_s4 = sshll.u32 %s1003_s23, 4 }
  0xe5   : > { %s363_s5 = scalar_lea.vmem %s986_s8, %s543_s4 [#allocation6]   ;;  %s365_s6 = scalar_lea.vmem %s997_s9, %s543_s4  }
  0xe6   : > { %p536_p9 = scmp.le.s32.totalorder %s1013_s27, 0 }
  0xe7   : > { %s819_s15 = smov (!%p536_p9), %s365_s6   ;;  %s823_s7 = smov (!%p536_p9), %s363_s5  }
  0xe8   : > { %465 = sbr.rel (%p536_p9) target bundleno = 245 (0xf5), region = 141  ;;  %s827_s22 = smov (!%p536_p9), 0  }
  0xe9   : > { %s831_s24 = smov (!%p536_p9), 0  }
  0xed LB: >> { %v375_v13 = vld [vmem:[%s825_s7] sm:$0xff]  ;;  %s377_s12 = sadd.s32 1, %s829_s22  ;;  %s369_s24 = sadd.s32 1, %s833_s24   ;;  %s833_s24 = sphi %s831_s24, %s369_s24   ;;  %s829_s22 = sphi %s827_s22, %s828_s22   ;;  %s825_s7 = sphi %s823_s7, %s382_s7   ;;  %s821_s15 = sphi %s819_s15, %s383_s15  }
  0xee   : >> { %376 = vst [vmem:[%s821_s15] sm:$0xff] %v375_v13  ;;  %p378_p12 = scmp.ge.s32.totalorder %s377_s12, %s1013_s27  ;;  %p368_p13 = scmp.ge.s32.totalorder %s369_s24, %s1013_s27 }
  0xf0   : >> { %s1057_s12 = smov (%p378_p12, %s377_s12), 0  ;;  %371 = sbr.rel (!%p368_p13) target bundleno = 237 (0xed), region = 147 }
  0xf1   : >> { %s537_s8 = sshll.u32 %s1057_s12, 3  ;;  %s828_s22 = smov %s1057_s12  }
  0xf2   : >> { %s382_s7 = scalar_lea.vmem %s363_s5, %s537_s8 [#allocation6]   ;;  %s383_s15 = scalar_lea.vmem %s365_s6, %s537_s8  }
  0xf5 PF: > { %p14_p0 = scmp.ge.s32.totalorder %s883_s17, 4   ;;  %s1046_s12 = smov %s793_s13 }
  0xf6   : > { %s1047_s13 = smov %s797_s14  ;;  %s1048_s14 = smov %s893_s20 }
  0xf7   : > { %s1049_s15 = smov %s883_s17  ;;  %16 = sbr.rel (!%p14_p0) target bundleno = 4 (0x4), region = 158 }
  0xfc   :  { %399 = vsyncpa [#allocation3], 1 }
  0xfd   :  { %401 = vsyncpa [#allocation3 + $0x1], 1 }
  0xfe   :  { %402 = vsyncpa [#allocation5], 1 }

</bundles_post_ra>
